<compile_context>
chip_gen: v7x
topology: tpu7x:2x2x1
jax: 0.10.0
libtpu: 0.0.40
codegen_flags: <defaults>
</compile_context>

<pallas_src>
import functools
import math

import jax
import jax.numpy as jnp
from jax.experimental import pallas as pl
from jax.experimental.pallas import tpu as pltpu


# ----------------------------------------------------------------------------
# Kernel: gather `tokens_per_block` embedding rows per grid step.
#   ids_ref : SMEM (N_pad,) int32     -- scalar-prefetched token ids
#   w_hbm   : HBM  (V, D)             -- embedding table, never fully loaded
#   out_ref : VMEM (T, D)             -- pipelined output tile
#   row_buf : VMEM (T, D) scratch     -- DMA staging buffer
#   sems    : DMA semaphores (T,)
# ----------------------------------------------------------------------------
def embedding_kernel(ids_ref, w_hbm, out_ref, row_buf, sems, *, tokens_per_block):
    base = pl.program_id(0) * tokens_per_block

    # Issue all row gathers for this block (they run concurrently).
    for t in range(tokens_per_block):
        idx = ids_ref[base + t]
        pltpu.make_async_copy(w_hbm.at[idx], row_buf.at[t], sems.at[t]).start()

    # Wait for every row, then publish the lane-dense (T, D) output tile.
    for t in range(tokens_per_block):
        idx = ids_ref[base + t]
        pltpu.make_async_copy(w_hbm.at[idx], row_buf.at[t], sems.at[t]).wait()

    out_ref[...] = row_buf[...]


# ----------------------------------------------------------------------------
# Wrapper: flatten ids, pad to a multiple of the token block, run the gather,
# slice and reshape back to (*input_shape, D).
# ----------------------------------------------------------------------------
def vocab_embedding_pallas(input_ids, weight, *, tokens_per_block=8):
    V, D = weight.shape
    orig_shape = input_ids.shape

    # Flatten and clamp (defensive: keeps every manual DMA in-bounds).
    ids = jnp.clip(input_ids.reshape(-1).astype(jnp.int32), 0, V - 1)
    N = ids.shape[0]
    T = tokens_per_block
    n_blocks = pl.cdiv(N, T)
    N_pad = n_blocks * T
    if N_pad != N:
        ids = jnp.pad(ids, (0, N_pad - N))  # padded slots gather row 0, dropped later

    # NOTE: for very large N (millions of tokens) the id vector should itself be
    # tiled over the grid instead of fully scalar-prefetched into SMEM.
    kernel = functools.partial(embedding_kernel, tokens_per_block=T)

    out = pl.pallas_call(
        kernel,
        out_shape=jax.ShapeDtypeStruct((N_pad, D), weight.dtype),
        grid_spec=pltpu.PrefetchScalarGridSpec(
            num_scalar_prefetch=1,                      # ids -> SMEM, visible to index_maps
            grid=(n_blocks,),
            in_specs=[
                pl.BlockSpec(memory_space=pl.ANY),      # embedding table stays in HBM
            ],
            out_specs=pl.BlockSpec((T, D), lambda i, ids_ref: (i, 0)),
            scratch_shapes=[
                pltpu.VMEM((T, D), weight.dtype),       # row staging buffer
                pltpu.SemaphoreType.DMA((T,)),          # one sem per in-flight row DMA
            ],
        ),
        compiler_params=pltpu.CompilerParams(
            dimension_semantics=("parallel",),          # blocks are independent
        ),
    )(ids, weight)

    return out[:N].reshape(*orig_shape, D)


# ----------------------------------------------------------------------------
# Pure-JAX reference (mirrors torch.nn.functional.embedding, eval mode).
# ----------------------------------------------------------------------------
def vocab_embedding_ref(input_ids, weight):
    return jnp.take(weight, input_ids, axis=0)


# ----------------------------------------------------------------------------
# Main
# ----------------------------------------------------------------------------
if __name__ == "__main__":
    V, D = 512, 32      # vocab_size, hidden_size (small test shapes)
    B, S = 2, 8         # batch, sequence

    key = jax.random.PRNGKey(0)
    k_w, k_ids = jax.random.split(key)

    # xavier_normal_ init of the embedding table, as in the PyTorch module.
    std = math.sqrt(2.0 / (V + D))
    weight = (std * jax.random.normal(k_w, (V, D))).astype(jnp.float32)
    input_ids = jax.random.randint(k_ids, (B, S), 0, V, dtype=jnp.int32)

    out = vocab_embedding_pallas(input_ids, weight, tokens_per_block=8)
    out = jax.block_until_ready(out)

    ref = vocab_embedding_ref(input_ids, weight)
    assert out.shape == (B, S, D), out.shape
    assert out.dtype == weight.dtype
    assert jnp.array_equal(out, ref), float(jnp.max(jnp.abs(out - ref)))

    print("KERNEL_OK")
</pallas_src>

<mosaic_0001>
module attributes {stable_mosaic.version = 11 : i64} {
  func.func @embedding_kernel(%arg0: i32, %arg1: memref<16xi32, #tpu.memory_space<smem>>, %arg2: memref<512x32xf32, #tpu.memory_space<any>>, %arg3: memref<8x32xf32, #tpu.memory_space<vmem>>, %arg4: memref<8x32xf32, #tpu.memory_space<vmem>>, %arg5: memref<8x!tpu.dma_semaphore, #tpu.memory_space<semaphore_mem>>) attributes {dimension_semantics = [#tpu.dimension_semantics<parallel>], iteration_bounds = array<i64: 2>, scalar_prefetch = 1 : i64, scratch_operands = 2 : i64, tpu.core_type = #tpu.core_type<tc>, window_params = [{}, {transform_indices = @transform_1, window_bounds = array<i64: 8, 32>}]} {
    %c8_i32 = arith.constant 8 : i32
    %0 = arith.muli %arg0, %c8_i32 : i32
    %c0_i32 = arith.constant 0 : i32
    %1 = arith.addi %0, %c0_i32 : i32
    %2 = arith.index_cast %1 : i32 to index
    %3 = memref.load %arg1[%2] : memref<16xi32, #tpu.memory_space<smem>>
    %c0_i32_0 = arith.constant 0 : i32
    %c0_i32_1 = arith.constant 0 : i32
    %c0_i32_2 = arith.constant 0 : i32
    %4 = tpu.memref_slice %arg2[%3, %c0_i32_2] : memref<512x32xf32, #tpu.memory_space<any>> -> memref<1x32xf32, #tpu.memory_space<any>>
    %5 = tpu.memref_squeeze %4 : memref<1x32xf32, #tpu.memory_space<any>> -> memref<32xf32, #tpu.memory_space<any>>
    %c0_i32_3 = arith.constant 0 : i32
    %6 = tpu.memref_slice %arg4[%c0_i32_0, %c0_i32_3] : memref<8x32xf32, #tpu.memory_space<vmem>> -> memref<1x32xf32, #tpu.memory_space<vmem>>
    %7 = tpu.memref_squeeze %6 : memref<1x32xf32, #tpu.memory_space<vmem>> -> memref<32xf32, #tpu.memory_space<vmem>>
    %8 = tpu.memref_slice %arg5[%c0_i32_1] : memref<8x!tpu.dma_semaphore, #tpu.memory_space<semaphore_mem>> -> memref<1x!tpu.dma_semaphore, #tpu.memory_space<semaphore_mem>>
    %9 = tpu.memref_squeeze %8 : memref<1x!tpu.dma_semaphore, #tpu.memory_space<semaphore_mem>> -> memref<!tpu.dma_semaphore, #tpu.memory_space<semaphore_mem>>
    tpu.enqueue_dma source(%5 : memref<32xf32, #tpu.memory_space<any>>) target(%7 : memref<32xf32, #tpu.memory_space<vmem>>) target_semaphore(%9 : memref<!tpu.dma_semaphore, #tpu.memory_space<semaphore_mem>>)
    %c1_i32 = arith.constant 1 : i32
    %10 = arith.addi %0, %c1_i32 : i32
    %11 = arith.index_cast %10 : i32 to index
    %12 = memref.load %arg1[%11] : memref<16xi32, #tpu.memory_space<smem>>
    %c1_i32_4 = arith.constant 1 : i32
    %c1_i32_5 = arith.constant 1 : i32
    %c0_i32_6 = arith.constant 0 : i32
    %13 = tpu.memref_slice %arg2[%12, %c0_i32_6] : memref<512x32xf32, #tpu.memory_space<any>> -> memref<1x32xf32, #tpu.memory_space<any>>
    %14 = tpu.memref_squeeze %13 : memref<1x32xf32, #tpu.memory_space<any>> -> memref<32xf32, #tpu.memory_space<any>>
    %c0_i32_7 = arith.constant 0 : i32
    %15 = tpu.memref_slice %arg4[%c1_i32_4, %c0_i32_7] : memref<8x32xf32, #tpu.memory_space<vmem>> -> memref<1x32xf32, #tpu.memory_space<vmem>>
    %16 = tpu.memref_squeeze %15 : memref<1x32xf32, #tpu.memory_space<vmem>> -> memref<32xf32, #tpu.memory_space<vmem>>
    %17 = tpu.memref_slice %arg5[%c1_i32_5] : memref<8x!tpu.dma_semaphore, #tpu.memory_space<semaphore_mem>> -> memref<1x!tpu.dma_semaphore, #tpu.memory_space<semaphore_mem>>
    %18 = tpu.memref_squeeze %17 : memref<1x!tpu.dma_semaphore, #tpu.memory_space<semaphore_mem>> -> memref<!tpu.dma_semaphore, #tpu.memory_space<semaphore_mem>>
    tpu.enqueue_dma source(%14 : memref<32xf32, #tpu.memory_space<any>>) target(%16 : memref<32xf32, #tpu.memory_space<vmem>>) target_semaphore(%18 : memref<!tpu.dma_semaphore, #tpu.memory_space<semaphore_mem>>)
    %c2_i32 = arith.constant 2 : i32
    %19 = arith.addi %0, %c2_i32 : i32
    %20 = arith.index_cast %19 : i32 to index
    %21 = memref.load %arg1[%20] : memref<16xi32, #tpu.memory_space<smem>>
    %c2_i32_8 = arith.constant 2 : i32
    %c2_i32_9 = arith.constant 2 : i32
    %c0_i32_10 = arith.constant 0 : i32
    %22 = tpu.memref_slice %arg2[%21, %c0_i32_10] : memref<512x32xf32, #tpu.memory_space<any>> -> memref<1x32xf32, #tpu.memory_space<any>>
    %23 = tpu.memref_squeeze %22 : memref<1x32xf32, #tpu.memory_space<any>> -> memref<32xf32, #tpu.memory_space<any>>
    %c0_i32_11 = arith.constant 0 : i32
    %24 = tpu.memref_slice %arg4[%c2_i32_8, %c0_i32_11] : memref<8x32xf32, #tpu.memory_space<vmem>> -> memref<1x32xf32, #tpu.memory_space<vmem>>
    %25 = tpu.memref_squeeze %24 : memref<1x32xf32, #tpu.memory_space<vmem>> -> memref<32xf32, #tpu.memory_space<vmem>>
    %26 = tpu.memref_slice %arg5[%c2_i32_9] : memref<8x!tpu.dma_semaphore, #tpu.memory_space<semaphore_mem>> -> memref<1x!tpu.dma_semaphore, #tpu.memory_space<semaphore_mem>>
    %27 = tpu.memref_squeeze %26 : memref<1x!tpu.dma_semaphore, #tpu.memory_space<semaphore_mem>> -> memref<!tpu.dma_semaphore, #tpu.memory_space<semaphore_mem>>
    tpu.enqueue_dma source(%23 : memref<32xf32, #tpu.memory_space<any>>) target(%25 : memref<32xf32, #tpu.memory_space<vmem>>) target_semaphore(%27 : memref<!tpu.dma_semaphore, #tpu.memory_space<semaphore_mem>>)
    %c3_i32 = arith.constant 3 : i32
    %28 = arith.addi %0, %c3_i32 : i32
    %29 = arith.index_cast %28 : i32 to index
    %30 = memref.load %arg1[%29] : memref<16xi32, #tpu.memory_space<smem>>
    %c3_i32_12 = arith.constant 3 : i32
    %c3_i32_13 = arith.constant 3 : i32
    %c0_i32_14 = arith.constant 0 : i32
    %31 = tpu.memref_slice %arg2[%30, %c0_i32_14] : memref<512x32xf32, #tpu.memory_space<any>> -> memref<1x32xf32, #tpu.memory_space<any>>
    %32 = tpu.memref_squeeze %31 : memref<1x32xf32, #tpu.memory_space<any>> -> memref<32xf32, #tpu.memory_space<any>>
    %c0_i32_15 = arith.constant 0 : i32
    %33 = tpu.memref_slice %arg4[%c3_i32_12, %c0_i32_15] : memref<8x32xf32, #tpu.memory_space<vmem>> -> memref<1x32xf32, #tpu.memory_space<vmem>>
    %34 = tpu.memref_squeeze %33 : memref<1x32xf32, #tpu.memory_space<vmem>> -> memref<32xf32, #tpu.memory_space<vmem>>
    %35 = tpu.memref_slice %arg5[%c3_i32_13] : memref<8x!tpu.dma_semaphore, #tpu.memory_space<semaphore_mem>> -> memref<1x!tpu.dma_semaphore, #tpu.memory_space<semaphore_mem>>
    %36 = tpu.memref_squeeze %35 : memref<1x!tpu.dma_semaphore, #tpu.memory_space<semaphore_mem>> -> memref<!tpu.dma_semaphore, #tpu.memory_space<semaphore_mem>>
    tpu.enqueue_dma source(%32 : memref<32xf32, #tpu.memory_space<any>>) target(%34 : memref<32xf32, #tpu.memory_space<vmem>>) target_semaphore(%36 : memref<!tpu.dma_semaphore, #tpu.memory_space<semaphore_mem>>)
    %c4_i32 = arith.constant 4 : i32
    %37 = arith.addi %0, %c4_i32 : i32
    %38 = arith.index_cast %37 : i32 to index
    %39 = memref.load %arg1[%38] : memref<16xi32, #tpu.memory_space<smem>>
    %c4_i32_16 = arith.constant 4 : i32
    %c4_i32_17 = arith.constant 4 : i32
    %c0_i32_18 = arith.constant 0 : i32
    %40 = tpu.memref_slice %arg2[%39, %c0_i32_18] : memref<512x32xf32, #tpu.memory_space<any>> -> memref<1x32xf32, #tpu.memory_space<any>>
    %41 = tpu.memref_squeeze %40 : memref<1x32xf32, #tpu.memory_space<any>> -> memref<32xf32, #tpu.memory_space<any>>
    %c0_i32_19 = arith.constant 0 : i32
    %42 = tpu.memref_slice %arg4[%c4_i32_16, %c0_i32_19] : memref<8x32xf32, #tpu.memory_space<vmem>> -> memref<1x32xf32, #tpu.memory_space<vmem>>
    %43 = tpu.memref_squeeze %42 : memref<1x32xf32, #tpu.memory_space<vmem>> -> memref<32xf32, #tpu.memory_space<vmem>>
    %44 = tpu.memref_slice %arg5[%c4_i32_17] : memref<8x!tpu.dma_semaphore, #tpu.memory_space<semaphore_mem>> -> memref<1x!tpu.dma_semaphore, #tpu.memory_space<semaphore_mem>>
    %45 = tpu.memref_squeeze %44 : memref<1x!tpu.dma_semaphore, #tpu.memory_space<semaphore_mem>> -> memref<!tpu.dma_semaphore, #tpu.memory_space<semaphore_mem>>
    tpu.enqueue_dma source(%41 : memref<32xf32, #tpu.memory_space<any>>) target(%43 : memref<32xf32, #tpu.memory_space<vmem>>) target_semaphore(%45 : memref<!tpu.dma_semaphore, #tpu.memory_space<semaphore_mem>>)
    %c5_i32 = arith.constant 5 : i32
    %46 = arith.addi %0, %c5_i32 : i32
    %47 = arith.index_cast %46 : i32 to index
    %48 = memref.load %arg1[%47] : memref<16xi32, #tpu.memory_space<smem>>
    %c5_i32_20 = arith.constant 5 : i32
    %c5_i32_21 = arith.constant 5 : i32
    %c0_i32_22 = arith.constant 0 : i32
    %49 = tpu.memref_slice %arg2[%48, %c0_i32_22] : memref<512x32xf32, #tpu.memory_space<any>> -> memref<1x32xf32, #tpu.memory_space<any>>
    %50 = tpu.memref_squeeze %49 : memref<1x32xf32, #tpu.memory_space<any>> -> memref<32xf32, #tpu.memory_space<any>>
    %c0_i32_23 = arith.constant 0 : i32
    %51 = tpu.memref_slice %arg4[%c5_i32_20, %c0_i32_23] : memref<8x32xf32, #tpu.memory_space<vmem>> -> memref<1x32xf32, #tpu.memory_space<vmem>>
    %52 = tpu.memref_squeeze %51 : memref<1x32xf32, #tpu.memory_space<vmem>> -> memref<32xf32, #tpu.memory_space<vmem>>
    %53 = tpu.memref_slice %arg5[%c5_i32_21] : memref<8x!tpu.dma_semaphore, #tpu.memory_space<semaphore_mem>> -> memref<1x!tpu.dma_semaphore, #tpu.memory_space<semaphore_mem>>
    %54 = tpu.memref_squeeze %53 : memref<1x!tpu.dma_semaphore, #tpu.memory_space<semaphore_mem>> -> memref<!tpu.dma_semaphore, #tpu.memory_space<semaphore_mem>>
    tpu.enqueue_dma source(%50 : memref<32xf32, #tpu.memory_space<any>>) target(%52 : memref<32xf32, #tpu.memory_space<vmem>>) target_semaphore(%54 : memref<!tpu.dma_semaphore, #tpu.memory_space<semaphore_mem>>)
    %c6_i32 = arith.constant 6 : i32
    %55 = arith.addi %0, %c6_i32 : i32
    %56 = arith.index_cast %55 : i32 to index
    %57 = memref.load %arg1[%56] : memref<16xi32, #tpu.memory_space<smem>>
    %c6_i32_24 = arith.constant 6 : i32
    %c6_i32_25 = arith.constant 6 : i32
    %c0_i32_26 = arith.constant 0 : i32
    %58 = tpu.memref_slice %arg2[%57, %c0_i32_26] : memref<512x32xf32, #tpu.memory_space<any>> -> memref<1x32xf32, #tpu.memory_space<any>>
    %59 = tpu.memref_squeeze %58 : memref<1x32xf32, #tpu.memory_space<any>> -> memref<32xf32, #tpu.memory_space<any>>
    %c0_i32_27 = arith.constant 0 : i32
    %60 = tpu.memref_slice %arg4[%c6_i32_24, %c0_i32_27] : memref<8x32xf32, #tpu.memory_space<vmem>> -> memref<1x32xf32, #tpu.memory_space<vmem>>
    %61 = tpu.memref_squeeze %60 : memref<1x32xf32, #tpu.memory_space<vmem>> -> memref<32xf32, #tpu.memory_space<vmem>>
    %62 = tpu.memref_slice %arg5[%c6_i32_25] : memref<8x!tpu.dma_semaphore, #tpu.memory_space<semaphore_mem>> -> memref<1x!tpu.dma_semaphore, #tpu.memory_space<semaphore_mem>>
    %63 = tpu.memref_squeeze %62 : memref<1x!tpu.dma_semaphore, #tpu.memory_space<semaphore_mem>> -> memref<!tpu.dma_semaphore, #tpu.memory_space<semaphore_mem>>
    tpu.enqueue_dma source(%59 : memref<32xf32, #tpu.memory_space<any>>) target(%61 : memref<32xf32, #tpu.memory_space<vmem>>) target_semaphore(%63 : memref<!tpu.dma_semaphore, #tpu.memory_space<semaphore_mem>>)
    %c7_i32 = arith.constant 7 : i32
    %64 = arith.addi %0, %c7_i32 : i32
    %65 = arith.index_cast %64 : i32 to index
    %66 = memref.load %arg1[%65] : memref<16xi32, #tpu.memory_space<smem>>
    %c7_i32_28 = arith.constant 7 : i32
    %c7_i32_29 = arith.constant 7 : i32
    %c0_i32_30 = arith.constant 0 : i32
    %67 = tpu.memref_slice %arg2[%66, %c0_i32_30] : memref<512x32xf32, #tpu.memory_space<any>> -> memref<1x32xf32, #tpu.memory_space<any>>
    %68 = tpu.memref_squeeze %67 : memref<1x32xf32, #tpu.memory_space<any>> -> memref<32xf32, #tpu.memory_space<any>>
    %c0_i32_31 = arith.constant 0 : i32
    %69 = tpu.memref_slice %arg4[%c7_i32_28, %c0_i32_31] : memref<8x32xf32, #tpu.memory_space<vmem>> -> memref<1x32xf32, #tpu.memory_space<vmem>>
    %70 = tpu.memref_squeeze %69 : memref<1x32xf32, #tpu.memory_space<vmem>> -> memref<32xf32, #tpu.memory_space<vmem>>
    %71 = tpu.memref_slice %arg5[%c7_i32_29] : memref<8x!tpu.dma_semaphore, #tpu.memory_space<semaphore_mem>> -> memref<1x!tpu.dma_semaphore, #tpu.memory_space<semaphore_mem>>
    %72 = tpu.memref_squeeze %71 : memref<1x!tpu.dma_semaphore, #tpu.memory_space<semaphore_mem>> -> memref<!tpu.dma_semaphore, #tpu.memory_space<semaphore_mem>>
    tpu.enqueue_dma source(%68 : memref<32xf32, #tpu.memory_space<any>>) target(%70 : memref<32xf32, #tpu.memory_space<vmem>>) target_semaphore(%72 : memref<!tpu.dma_semaphore, #tpu.memory_space<semaphore_mem>>)
    %c0_i32_32 = arith.constant 0 : i32
    %73 = arith.addi %0, %c0_i32_32 : i32
    %74 = arith.index_cast %73 : i32 to index
    %75 = memref.load %arg1[%74] : memref<16xi32, #tpu.memory_space<smem>>
    %c0_i32_33 = arith.constant 0 : i32
    %c0_i32_34 = arith.constant 0 : i32
    %c0_i32_35 = arith.constant 0 : i32
    %76 = tpu.memref_slice %arg2[%75, %c0_i32_35] : memref<512x32xf32, #tpu.memory_space<any>> -> memref<1x32xf32, #tpu.memory_space<any>>
    %77 = tpu.memref_squeeze %76 : memref<1x32xf32, #tpu.memory_space<any>> -> memref<32xf32, #tpu.memory_space<any>>
    %c0_i32_36 = arith.constant 0 : i32
    %78 = tpu.memref_slice %arg4[%c0_i32_33, %c0_i32_36] : memref<8x32xf32, #tpu.memory_space<vmem>> -> memref<1x32xf32, #tpu.memory_space<vmem>>
    %79 = tpu.memref_squeeze %78 : memref<1x32xf32, #tpu.memory_space<vmem>> -> memref<32xf32, #tpu.memory_space<vmem>>
    %80 = tpu.memref_slice %arg5[%c0_i32_34] : memref<8x!tpu.dma_semaphore, #tpu.memory_space<semaphore_mem>> -> memref<1x!tpu.dma_semaphore, #tpu.memory_space<semaphore_mem>>
    %81 = tpu.memref_squeeze %80 : memref<1x!tpu.dma_semaphore, #tpu.memory_space<semaphore_mem>> -> memref<!tpu.dma_semaphore, #tpu.memory_space<semaphore_mem>>
    tpu.wait_dma2 semaphore(%81 : memref<!tpu.dma_semaphore, #tpu.memory_space<semaphore_mem>>) src(%77 : memref<32xf32, #tpu.memory_space<any>>) dst(%79 : memref<32xf32, #tpu.memory_space<vmem>>)
    %c1_i32_37 = arith.constant 1 : i32
    %82 = arith.addi %0, %c1_i32_37 : i32
    %83 = arith.index_cast %82 : i32 to index
    %84 = memref.load %arg1[%83] : memref<16xi32, #tpu.memory_space<smem>>
    %c1_i32_38 = arith.constant 1 : i32
    %c1_i32_39 = arith.constant 1 : i32
    %c0_i32_40 = arith.constant 0 : i32
    %85 = tpu.memref_slice %arg2[%84, %c0_i32_40] : memref<512x32xf32, #tpu.memory_space<any>> -> memref<1x32xf32, #tpu.memory_space<any>>
    %86 = tpu.memref_squeeze %85 : memref<1x32xf32, #tpu.memory_space<any>> -> memref<32xf32, #tpu.memory_space<any>>
    %c0_i32_41 = arith.constant 0 : i32
    %87 = tpu.memref_slice %arg4[%c1_i32_38, %c0_i32_41] : memref<8x32xf32, #tpu.memory_space<vmem>> -> memref<1x32xf32, #tpu.memory_space<vmem>>
    %88 = tpu.memref_squeeze %87 : memref<1x32xf32, #tpu.memory_space<vmem>> -> memref<32xf32, #tpu.memory_space<vmem>>
    %89 = tpu.memref_slice %arg5[%c1_i32_39] : memref<8x!tpu.dma_semaphore, #tpu.memory_space<semaphore_mem>> -> memref<1x!tpu.dma_semaphore, #tpu.memory_space<semaphore_mem>>
    %90 = tpu.memref_squeeze %89 : memref<1x!tpu.dma_semaphore, #tpu.memory_space<semaphore_mem>> -> memref<!tpu.dma_semaphore, #tpu.memory_space<semaphore_mem>>
    tpu.wait_dma2 semaphore(%90 : memref<!tpu.dma_semaphore, #tpu.memory_space<semaphore_mem>>) src(%86 : memref<32xf32, #tpu.memory_space<any>>) dst(%88 : memref<32xf32, #tpu.memory_space<vmem>>)
    %c2_i32_42 = arith.constant 2 : i32
    %91 = arith.addi %0, %c2_i32_42 : i32
    %92 = arith.index_cast %91 : i32 to index
    %93 = memref.load %arg1[%92] : memref<16xi32, #tpu.memory_space<smem>>
    %c2_i32_43 = arith.constant 2 : i32
    %c2_i32_44 = arith.constant 2 : i32
    %c0_i32_45 = arith.constant 0 : i32
    %94 = tpu.memref_slice %arg2[%93, %c0_i32_45] : memref<512x32xf32, #tpu.memory_space<any>> -> memref<1x32xf32, #tpu.memory_space<any>>
    %95 = tpu.memref_squeeze %94 : memref<1x32xf32, #tpu.memory_space<any>> -> memref<32xf32, #tpu.memory_space<any>>
    %c0_i32_46 = arith.constant 0 : i32
    %96 = tpu.memref_slice %arg4[%c2_i32_43, %c0_i32_46] : memref<8x32xf32, #tpu.memory_space<vmem>> -> memref<1x32xf32, #tpu.memory_space<vmem>>
    %97 = tpu.memref_squeeze %96 : memref<1x32xf32, #tpu.memory_space<vmem>> -> memref<32xf32, #tpu.memory_space<vmem>>
    %98 = tpu.memref_slice %arg5[%c2_i32_44] : memref<8x!tpu.dma_semaphore, #tpu.memory_space<semaphore_mem>> -> memref<1x!tpu.dma_semaphore, #tpu.memory_space<semaphore_mem>>
    %99 = tpu.memref_squeeze %98 : memref<1x!tpu.dma_semaphore, #tpu.memory_space<semaphore_mem>> -> memref<!tpu.dma_semaphore, #tpu.memory_space<semaphore_mem>>
    tpu.wait_dma2 semaphore(%99 : memref<!tpu.dma_semaphore, #tpu.memory_space<semaphore_mem>>) src(%95 : memref<32xf32, #tpu.memory_space<any>>) dst(%97 : memref<32xf32, #tpu.memory_space<vmem>>)
    %c3_i32_47 = arith.constant 3 : i32
    %100 = arith.addi %0, %c3_i32_47 : i32
    %101 = arith.index_cast %100 : i32 to index
    %102 = memref.load %arg1[%101] : memref<16xi32, #tpu.memory_space<smem>>
    %c3_i32_48 = arith.constant 3 : i32
    %c3_i32_49 = arith.constant 3 : i32
    %c0_i32_50 = arith.constant 0 : i32
    %103 = tpu.memref_slice %arg2[%102, %c0_i32_50] : memref<512x32xf32, #tpu.memory_space<any>> -> memref<1x32xf32, #tpu.memory_space<any>>
    %104 = tpu.memref_squeeze %103 : memref<1x32xf32, #tpu.memory_space<any>> -> memref<32xf32, #tpu.memory_space<any>>
    %c0_i32_51 = arith.constant 0 : i32
    %105 = tpu.memref_slice %arg4[%c3_i32_48, %c0_i32_51] : memref<8x32xf32, #tpu.memory_space<vmem>> -> memref<1x32xf32, #tpu.memory_space<vmem>>
    %106 = tpu.memref_squeeze %105 : memref<1x32xf32, #tpu.memory_space<vmem>> -> memref<32xf32, #tpu.memory_space<vmem>>
    %107 = tpu.memref_slice %arg5[%c3_i32_49] : memref<8x!tpu.dma_semaphore, #tpu.memory_space<semaphore_mem>> -> memref<1x!tpu.dma_semaphore, #tpu.memory_space<semaphore_mem>>
    %108 = tpu.memref_squeeze %107 : memref<1x!tpu.dma_semaphore, #tpu.memory_space<semaphore_mem>> -> memref<!tpu.dma_semaphore, #tpu.memory_space<semaphore_mem>>
    tpu.wait_dma2 semaphore(%108 : memref<!tpu.dma_semaphore, #tpu.memory_space<semaphore_mem>>) src(%104 : memref<32xf32, #tpu.memory_space<any>>) dst(%106 : memref<32xf32, #tpu.memory_space<vmem>>)
    %c4_i32_52 = arith.constant 4 : i32
    %109 = arith.addi %0, %c4_i32_52 : i32
    %110 = arith.index_cast %109 : i32 to index
    %111 = memref.load %arg1[%110] : memref<16xi32, #tpu.memory_space<smem>>
    %c4_i32_53 = arith.constant 4 : i32
    %c4_i32_54 = arith.constant 4 : i32
    %c0_i32_55 = arith.constant 0 : i32
    %112 = tpu.memref_slice %arg2[%111, %c0_i32_55] : memref<512x32xf32, #tpu.memory_space<any>> -> memref<1x32xf32, #tpu.memory_space<any>>
    %113 = tpu.memref_squeeze %112 : memref<1x32xf32, #tpu.memory_space<any>> -> memref<32xf32, #tpu.memory_space<any>>
    %c0_i32_56 = arith.constant 0 : i32
    %114 = tpu.memref_slice %arg4[%c4_i32_53, %c0_i32_56] : memref<8x32xf32, #tpu.memory_space<vmem>> -> memref<1x32xf32, #tpu.memory_space<vmem>>
    %115 = tpu.memref_squeeze %114 : memref<1x32xf32, #tpu.memory_space<vmem>> -> memref<32xf32, #tpu.memory_space<vmem>>
    %116 = tpu.memref_slice %arg5[%c4_i32_54] : memref<8x!tpu.dma_semaphore, #tpu.memory_space<semaphore_mem>> -> memref<1x!tpu.dma_semaphore, #tpu.memory_space<semaphore_mem>>
    %117 = tpu.memref_squeeze %116 : memref<1x!tpu.dma_semaphore, #tpu.memory_space<semaphore_mem>> -> memref<!tpu.dma_semaphore, #tpu.memory_space<semaphore_mem>>
    tpu.wait_dma2 semaphore(%117 : memref<!tpu.dma_semaphore, #tpu.memory_space<semaphore_mem>>) src(%113 : memref<32xf32, #tpu.memory_space<any>>) dst(%115 : memref<32xf32, #tpu.memory_space<vmem>>)
    %c5_i32_57 = arith.constant 5 : i32
    %118 = arith.addi %0, %c5_i32_57 : i32
    %119 = arith.index_cast %118 : i32 to index
    %120 = memref.load %arg1[%119] : memref<16xi32, #tpu.memory_space<smem>>
    %c5_i32_58 = arith.constant 5 : i32
    %c5_i32_59 = arith.constant 5 : i32
    %c0_i32_60 = arith.constant 0 : i32
    %121 = tpu.memref_slice %arg2[%120, %c0_i32_60] : memref<512x32xf32, #tpu.memory_space<any>> -> memref<1x32xf32, #tpu.memory_space<any>>
    %122 = tpu.memref_squeeze %121 : memref<1x32xf32, #tpu.memory_space<any>> -> memref<32xf32, #tpu.memory_space<any>>
    %c0_i32_61 = arith.constant 0 : i32
    %123 = tpu.memref_slice %arg4[%c5_i32_58, %c0_i32_61] : memref<8x32xf32, #tpu.memory_space<vmem>> -> memref<1x32xf32, #tpu.memory_space<vmem>>
    %124 = tpu.memref_squeeze %123 : memref<1x32xf32, #tpu.memory_space<vmem>> -> memref<32xf32, #tpu.memory_space<vmem>>
    %125 = tpu.memref_slice %arg5[%c5_i32_59] : memref<8x!tpu.dma_semaphore, #tpu.memory_space<semaphore_mem>> -> memref<1x!tpu.dma_semaphore, #tpu.memory_space<semaphore_mem>>
    %126 = tpu.memref_squeeze %125 : memref<1x!tpu.dma_semaphore, #tpu.memory_space<semaphore_mem>> -> memref<!tpu.dma_semaphore, #tpu.memory_space<semaphore_mem>>
    tpu.wait_dma2 semaphore(%126 : memref<!tpu.dma_semaphore, #tpu.memory_space<semaphore_mem>>) src(%122 : memref<32xf32, #tpu.memory_space<any>>) dst(%124 : memref<32xf32, #tpu.memory_space<vmem>>)
    %c6_i32_62 = arith.constant 6 : i32
    %127 = arith.addi %0, %c6_i32_62 : i32
    %128 = arith.index_cast %127 : i32 to index
    %129 = memref.load %arg1[%128] : memref<16xi32, #tpu.memory_space<smem>>
    %c6_i32_63 = arith.constant 6 : i32
    %c6_i32_64 = arith.constant 6 : i32
    %c0_i32_65 = arith.constant 0 : i32
    %130 = tpu.memref_slice %arg2[%129, %c0_i32_65] : memref<512x32xf32, #tpu.memory_space<any>> -> memref<1x32xf32, #tpu.memory_space<any>>
    %131 = tpu.memref_squeeze %130 : memref<1x32xf32, #tpu.memory_space<any>> -> memref<32xf32, #tpu.memory_space<any>>
    %c0_i32_66 = arith.constant 0 : i32
    %132 = tpu.memref_slice %arg4[%c6_i32_63, %c0_i32_66] : memref<8x32xf32, #tpu.memory_space<vmem>> -> memref<1x32xf32, #tpu.memory_space<vmem>>
    %133 = tpu.memref_squeeze %132 : memref<1x32xf32, #tpu.memory_space<vmem>> -> memref<32xf32, #tpu.memory_space<vmem>>
    %134 = tpu.memref_slice %arg5[%c6_i32_64] : memref<8x!tpu.dma_semaphore, #tpu.memory_space<semaphore_mem>> -> memref<1x!tpu.dma_semaphore, #tpu.memory_space<semaphore_mem>>
    %135 = tpu.memref_squeeze %134 : memref<1x!tpu.dma_semaphore, #tpu.memory_space<semaphore_mem>> -> memref<!tpu.dma_semaphore, #tpu.memory_space<semaphore_mem>>
    tpu.wait_dma2 semaphore(%135 : memref<!tpu.dma_semaphore, #tpu.memory_space<semaphore_mem>>) src(%131 : memref<32xf32, #tpu.memory_space<any>>) dst(%133 : memref<32xf32, #tpu.memory_space<vmem>>)
    %c7_i32_67 = arith.constant 7 : i32
    %136 = arith.addi %0, %c7_i32_67 : i32
    %137 = arith.index_cast %136 : i32 to index
    %138 = memref.load %arg1[%137] : memref<16xi32, #tpu.memory_space<smem>>
    %c7_i32_68 = arith.constant 7 : i32
    %c7_i32_69 = arith.constant 7 : i32
    %c0_i32_70 = arith.constant 0 : i32
    %139 = tpu.memref_slice %arg2[%138, %c0_i32_70] : memref<512x32xf32, #tpu.memory_space<any>> -> memref<1x32xf32, #tpu.memory_space<any>>
    %140 = tpu.memref_squeeze %139 : memref<1x32xf32, #tpu.memory_space<any>> -> memref<32xf32, #tpu.memory_space<any>>
    %c0_i32_71 = arith.constant 0 : i32
    %141 = tpu.memref_slice %arg4[%c7_i32_68, %c0_i32_71] : memref<8x32xf32, #tpu.memory_space<vmem>> -> memref<1x32xf32, #tpu.memory_space<vmem>>
    %142 = tpu.memref_squeeze %141 : memref<1x32xf32, #tpu.memory_space<vmem>> -> memref<32xf32, #tpu.memory_space<vmem>>
    %143 = tpu.memref_slice %arg5[%c7_i32_69] : memref<8x!tpu.dma_semaphore, #tpu.memory_space<semaphore_mem>> -> memref<1x!tpu.dma_semaphore, #tpu.memory_space<semaphore_mem>>
    %144 = tpu.memref_squeeze %143 : memref<1x!tpu.dma_semaphore, #tpu.memory_space<semaphore_mem>> -> memref<!tpu.dma_semaphore, #tpu.memory_space<semaphore_mem>>
    tpu.wait_dma2 semaphore(%144 : memref<!tpu.dma_semaphore, #tpu.memory_space<semaphore_mem>>) src(%140 : memref<32xf32, #tpu.memory_space<any>>) dst(%142 : memref<32xf32, #tpu.memory_space<vmem>>)
    %c0 = arith.constant 0 : index
    %c0_72 = arith.constant 0 : index
    %145 = vector.load %arg4[%c0, %c0_72] : memref<8x32xf32, #tpu.memory_space<vmem>>, vector<8x32xf32>
    %c0_73 = arith.constant 0 : index
    %c0_74 = arith.constant 0 : index
    %146 = vector.load %arg3[%c0_73, %c0_74] : memref<8x32xf32, #tpu.memory_space<vmem>>, vector<8x32xf32>
    tpu.vector_store %arg3[%c0_73, %c0_74], %145 {strides = array<i32>} : memref<8x32xf32, #tpu.memory_space<vmem>>, vector<8x32xf32>,
    return
  }
  func.func @transform_1(%arg0: i32, %arg1: memref<16xi32, #tpu.memory_space<smem>>) -> (i32, i32) {
    %c0_i32 = arith.constant 0 : i32
    %c0_i32_0 = arith.constant 0 : i32
    return %arg0, %c0_i32 : i32, i32
  }
}

</mosaic_0001>

<bundles_post_ra>
// kernel: tpu_custom_call.1
= control target key start
LH: loop header
LB: loop body
LE: loop exit
PB: predicated region body
PF: predicated region fallthrough
CT: control target
= control target key end

     0   :  { %s960_s0 = inlined_call_operand.vmem [shape: s32[16], index: 0, kind: input, shape index: {}]   ;;  %s961_s1 = inlined_call_operand.vmem [shape: f32[512,32], index: 1, kind: input, shape index: {}]   ;;  %s962_s2 = inlined_call_operand.hbm [shape: f32[16,32], index: 2, kind: output, shape index: {}]  }
   0x1   :  { %s7_s11 = sshll.u32 %s960_s0, 4  ;;  %s8_s11 = int_to_ptr.vmem [resolvable:$true] %s7_s11 }
   0x2   :  { %s727_s12 = scalar_lea.vmem %s8_s11, 16  ;;  %p732_p1 = scmp.lt.s32.totalorder %s8_s11, %s8_s11 }
   0x3   :  { %p728_p0 = scmp.ne.s32.totalorder %s8_s11, %s727_s12  ;;  %p733_p2 = scmp.lt.s32.totalorder %s727_s12, %s727_s12 }
   0x5   :  { %p734_p3 = por %p733_p2, %p732_p1 }
   0x7   :  { %p735_p4 = pnand %p734_p3, %p728_p0 }
   0x9   :  { %738 = shalt.err (!%p735_p4)  }
   0xa   :  { %s813_s13 = smov [#allocation5]  }
   0xb   :  { %10 = dma.vmem_to_smem %s8_s11, 16, %s813_s13, [#allocation4] }
   0xc   :  { %779 = dma.done.wait [#allocation4], 16 }
   0xd   :  { %780 = vsyncadd [#allocation4], 4294967280 }
   0xe   :  { %12 = sfence }
   0xf   :  { %13 = vsyncpa [#allocation7], 0 }
  0x10   :  { %15 = vsyncpa [#allocation7 + $0x1], 0  ;;  %s833_s14 = smov 0   ;;  %s835_s15 = smov 0  }
  0x11   :  { %s837_s0 = smov 0  }
  0x12 LB: > { %s678_s16 = sadd.s32 4294967295, %s811_s0   ;;  %s850_s17 = sadd.s32 1, %s811_s0   ;;  %s811_s0 = sphi %s837_s0, %s967_s0   ;;  %s807_s15 = sphi %s835_s15, %s966_s15   ;;  %s803_s14 = sphi %s833_s14, %s965_s14  }
  0x13   : > { %s24_s18 = ssub.s32 %s811_s0, %s850_s17  ;;  %s27_s19 = sadd.s32 1, %s807_s15 }
  0x14   : > { %p25_p5 = scmp.eq.s32.totalorder %s24_s18, 0  ;;  %p679_p6 = scmp.ne.s32.totalorder %s24_s18, 0 }
  0x15   : > { %p31_p7 = scmp.eq.s32.totalorder %s811_s0, 1  ;;  %p36_p8 = scmp.ne.s32.totalorder %s807_s15, %s803_s14 }
  0x16   : > { %s859_s20 = scalar_select %p25_p5, %s807_s15, %s27_s19  }
  0x17   : > { %p861_p9 = por %p679_p6, %p31_p7  ;;  %p37_p10 = scmp.eq.s32.totalorder %s678_s16, 1 }
  0x18   : > { %p680_p12 = scmp.ge.s32.totalorder %s811_s0, 2 }
  0x19   : > { %p865_p11 = por %p37_p10, %p36_p8  ;;  %s51_s23 = sand.u32 (!%p680_p12), 1, %s807_s15  }
  0x1a   : > { %46 = sbr.rel (%p680_p12) target bundleno = 146 (0x92), region = 12  ;;  %s872_s24 = sshll.u32 (!%p680_p12), %s811_s0, 3 }
  0x1b   : > { %s876_s25 = sshll.u32 (!%p680_p12), %s51_s23, 3  ;;  %s55_s26 = sld [smem:[#allocation5 + %s872_s24]] (!%p680_p12) }
  0x1c   : > { %s53_s30 = scalar_lea.vmem (!%p680_p12), [#allocation6], %s876_s25 }
  0x21   : > { %s56_s29 = scalar_lea.vmem %s961_s1, %s55_s26 }
  0x22   : > { %v74_v0 = vld [vmem:[%s56_s29] sm:$0x1] }
  0x23   : > { %75 = vst [vmem:[#allocation2] sm:$0x1] %v74_v0 }
  0x24   : > { %100 = vsyncadd [#allocation3], 16  ;;  %s101_s3 = sadd.s32 1, %s872_s24 }
  0x25   : > { %s102_s4 = sld [smem:[#allocation5 + %s101_s3]] }
  0x2b   : > { %s103_s7 = scalar_lea.vmem %s961_s1, %s102_s4 }
  0x2c   : > { %v123_v1 = vld [vmem:[%s103_s7] sm:$0x1] }
  0x2d   : > { %124 = vst [vmem:[#allocation2 + $0x1] sm:$0x1] %v123_v1 }
  0x2e   : > { %149 = vsyncadd [#allocation3 + $0x1], 16  ;;  %s150_s8 = sadd.s32 2, %s872_s24 }
  0x2f   : > { %s151_s9 = sld [smem:[#allocation5 + %s150_s8]] }
  0x35   : > { %s152_s12 = scalar_lea.vmem %s961_s1, %s151_s9 }
  0x36   : > { %v172_v2 = vld [vmem:[%s152_s12] sm:$0x1] }
  0x37   : > { %173 = vst [vmem:[#allocation2 + $0x2] sm:$0x1] %v172_v2 }
  0x38   : > { %198 = vsyncadd [#allocation3 + $0x2], 16  ;;  %s199_s13 = sadd.s32 3, %s872_s24 }
  0x39   : > { %s200_s16 = sld [smem:[#allocation5 + %s199_s13]] }
  0x3f   : > { %s201_s26 = scalar_lea.vmem %s961_s1, %s200_s16 }
  0x40   : > { %v221_v3 = vld [vmem:[%s201_s26] sm:$0x1] }
  0x41   : > { %222 = vst [vmem:[#allocation2 + $0x3] sm:$0x1] %v221_v3 }
  0x42   : > { %247 = vsyncadd [#allocation3 + $0x3], 16  ;;  %s248_s27 = sadd.s32 4, %s872_s24 }
  0x43   : > { %s249_s28 = sld [smem:[#allocation5 + %s248_s27]] }
  0x49   : > { %s250_s4 = scalar_lea.vmem %s961_s1, %s249_s28 }
  0x4a   : > { %v270_v4 = vld [vmem:[%s250_s4] sm:$0x1] }
  0x4b   : > { %271 = vst [vmem:[#allocation2 + $0x4] sm:$0x1] %v270_v4 }
  0x4c   : > { %296 = vsyncadd [#allocation3 + $0x4], 16  ;;  %s297_s5 = sadd.s32 5, %s872_s24 }
  0x4d   : > { %s298_s6 = sld [smem:[#allocation5 + %s297_s5]] }
  0x53   : > { %s299_s9 = scalar_lea.vmem %s961_s1, %s298_s6 }
  0x54   : > { %v319_v5 = vld [vmem:[%s299_s9] sm:$0x1] }
  0x55   : > { %320 = vst [vmem:[#allocation2 + $0x5] sm:$0x1] %v319_v5 }
  0x56   : > { %345 = vsyncadd [#allocation3 + $0x5], 16  ;;  %s346_s10 = sadd.s32 6, %s872_s24 }
  0x57   : > { %s347_s11 = sld [smem:[#allocation5 + %s346_s10]] }
  0x5d   : > { %s348_s16 = scalar_lea.vmem %s961_s1, %s347_s11 }
  0x5e   : > { %v368_v6 = vld [vmem:[%s348_s16] sm:$0x1] }
  0x5f   : > { %369 = vst [vmem:[#allocation2 + $0x6] sm:$0x1] %v368_v6 }
  0x60   : > { %394 = vsyncadd [#allocation3 + $0x6], 16  ;;  %s395_s18 = sadd.s32 7, %s872_s24 }
  0x61   : > { %s396_s19 = sld [smem:[#allocation5 + %s395_s18]] }
  0x67   : > { %s397_s28 = scalar_lea.vmem %s961_s1, %s396_s19 }
  0x68   : > { %v417_v7 = vld [vmem:[%s397_s28] sm:$0x1] }
  0x69   : > { %418 = vst [vmem:[#allocation2 + $0x7] sm:$0x1] %v417_v7 }
  0x6a   : > { %443 = vsyncadd [#allocation3 + $0x7], 16 }
  0x6b   : > { %781 = dma.done.wait [#allocation3], 16 }
  0x6c   : > { %782 = vsyncadd [#allocation3], 4294967280 }
  0x6d   : > { %783 = dma.done.wait [#allocation3 + $0x1], 16 }
  0x6e   : > { %784 = vsyncadd [#allocation3 + $0x1], 4294967280 }
  0x6f   : > { %785 = dma.done.wait [#allocation3 + $0x2], 16 }
  0x70   : > { %786 = vsyncadd [#allocation3 + $0x2], 4294967280 }
  0x71   : > { %787 = dma.done.wait [#allocation3 + $0x3], 16 }
  0x72   : > { %788 = vsyncadd [#allocation3 + $0x3], 4294967280 }
  0x73   : > { %789 = dma.done.wait [#allocation3 + $0x4], 16 }
  0x74   : > { %790 = vsyncadd [#allocation3 + $0x4], 4294967280 }
  0x75   : > { %791 = dma.done.wait [#allocation3 + $0x5], 16 }
  0x76   : > { %792 = vsyncadd [#allocation3 + $0x5], 4294967280 }
  0x77   : > { %793 = dma.done.wait [#allocation3 + $0x6], 16 }
  0x78   : > { %794 = vsyncadd [#allocation3 + $0x6], 4294967280 }
  0x79   : > { %795 = dma.done.wait [#allocation3 + $0x7], 16 }
  0x7a   : > { %796 = vsyncadd [#allocation3 + $0x7], 4294967280  ;;  %s684_s24 = sshll.u32 %s811_s0, 7  ;;  %s485_s29 = sshll.u32 %s53_s30, 4  ;;  %vm469_vm0 = vcmask 261120   ;;  %v468_v8 = vld [vmem:[#allocation2] sm:$0xff]  ;;  %s919_s29 = int_to_ptr.vmem [resolvable:$true] %s485_s29 }
  0x7b   : > { %s917_s5 = scalar_lea.hbm %s962_s2, %s684_s24  ;;  %470 = vst.msk [vmem:[%s53_s30] sm:$0xff] %vm469_vm0, %v468_v8  ;;  %s472_s6 = scalar_lea.sflag [#allocation7], %s51_s23 }
  0x7c   : > { %s739_s7 = scalar_lea.vmem %s919_s29, 128  ;;  %s814_s8 = smov [#allocation6]  }
  0x7d   : > { %p740_p13 = scmp.ne.s32.totalorder %s919_s29, %s739_s7  ;;  %s743_s9 = sshll.u32 %s814_s8, 4  ;;  %s744_s9 = int_to_ptr.vmem [resolvable:$false] %s743_s9 }
  0x7e   : > { %s745_s10 = scalar_lea.vmem %s744_s9, 256  ;;  %p746_p2 = scmp.lt.s32.totalorder %s919_s29, %s744_s9 }
  0x7f   : > { %p741_p0 = pnand %p740_p13, %p861_p9  ;;  %p747_p3 = scmp.lt.s32.totalorder %s745_s10, %s739_s7 }
  0x81   : > { %p742_p1 = pneg %p741_p0  ;;  %p748_p4 = por %p747_p3, %p746_p2 }
  0x83   : > { %p749_p5 = pnand %p748_p4, %p742_p1 }
  0x85   : > { %752 = shalt.err (!%p749_p5)
}
  0x86   : > { %s753_s23 = scalar_lea.hbm %s917_s5, 128  ;;  %s757_s11 = scalar_lea.hbm %s962_s2, 256 }
  0x87   : > { %p754_p6 = scmp.ne.s32.totalorder %s917_s5, %s753_s23  ;;  %p758_p10 = scmp.lt.u32.totalorder %s917_s5, %s962_s2 }
  0x88   : > { %p759_p12 = scmp.lt.u32.totalorder %s757_s11, %s753_s23  ;;  %p761_p0 = scmp.lt.u32.totalorder %s753_s23, %s917_s5 }
  0x89   : > { %p755_p7 = pnand %p754_p6, %p861_p9 }
  0x8a   : > { %p760_p13 = por %p759_p12, %p758_p10 }
  0x8b   : > { %p756_p8 = pneg %p755_p7 }
  0x8c   : > { %p762_p1 = por %p761_p0, %p760_p13 }
  0x8e   : > { %p763_p2 = pnand %p762_p1, %p756_p8 }
  0x90   : > { %766 = shalt.err (!%p763_p2)
}
  0x91   : > { %695 = dma.vmem_to_hbm [thread:$0]  (%p861_p9), %s919_s29, 128, %s917_s5, %s472_s6  }
  0x92 PF: > { %p701_p3 = scmp.ge.s32.totalorder %s811_s0, 1  ;;  %s497_s16 = sand.u32 1, %s803_s14  }
  0x93   : > { %s498_s18 = scalar_lea.sflag [#allocation7], %s497_s16 }
  0x94   : > { %p698_p4 = pnand %p701_p3, %p865_p11 }
  0x96   : > { %798 = dma.done.wait (!%p698_p4), %s498_s18, 128  }
  0x97   : > { %800 = vsyncadd (!%p698_p4), %s498_s18, 4294967168  ;;  %p18_p5 = scmp.ge.s32.totalorder %s850_s17, 3   ;;  %s965_s14 = smov %s807_s15 }
  0x98   : > { %s966_s15 = smov %s859_s20  ;;  %s967_s0 = smov %s850_s17 }
  0x99   :  { %20 = sbr.rel (!%p18_p5) target bundleno = 18 (0x12), region = 393 }
  0xa0   :  { %503 = vsyncpa [#allocation7], 1 }
  0xa1   :  { %505 = vsyncpa [#allocation7 + $0x1], 1 }
  0xa2   :  { %506 = vsyncmov [#allocation3] }
  0xa5   :  { %s507_s0 = vpop.sfrf %506 }
  0xa6   :  { %p687_p9 = scmp.ne.s32.totalorder %s507_s0, 0 }
  0xa8   :  { %511 = shalt.err (%p687_p9)  }
  0xa9   :  { %513 = vsyncmov [#allocation3 + $0x1] }
  0xac   :  { %s514_s21 = vpop.sfrf %513 }
  0xad   :  { %p688_p11 = scmp.ne.s32.totalorder %s514_s21, 0 }
  0xaf   :  { %518 = shalt.err (%p688_p11)  }
  0xb0   :  { %520 = vsyncmov [#allocation3 + $0x2] }
  0xb3   :  { %s521_s22 = vpop.sfrf %520 }
  0xb4   :  { %p689_p6 = scmp.ne.s32.totalorder %s521_s22, 0 }
  0xb6   :  { %525 = shalt.err (%p689_p6)  }
  0xb7   :  { %527 = vsyncmov [#allocation3 + $0x3] }
  0xba   :  { %s528_s19 = vpop.sfrf %527 }
  0xbb   :  { %p690_p7 = scmp.ne.s32.totalorder %s528_s19, 0 }
  0xbd   :  { %532 = shalt.err (%p690_p7)  }
  0xbe   :  { %534 = vsyncmov [#allocation3 + $0x4] }
  0xc1   :  { %s535_s17 = vpop.sfrf %534 }
  0xc2   :  { %p691_p8 = scmp.ne.s32.totalorder %s535_s17, 0 }
  0xc4   :  { %539 = shalt.err (%p691_p8)  }
  0xc5   :  { %541 = vsyncmov [#allocation3 + $0x5] }
  0xc8   :  { %s542_s1 = vpop.sfrf %541 }
  0xc9   :  { %p692_p10 = scmp.ne.s32.totalorder %s542_s1, 0 }
  0xcb   :  { %546 = shalt.err (%p692_p10)  }
  0xcc   :  { %548 = vsyncmov [#allocation3 + $0x6] }
  0xcf   :  { %s549_s2 = vpop.sfrf %548 }
  0xd0   :  { %p693_p12 = scmp.ne.s32.totalorder %s549_s2, 0 }
  0xd2   :  { %553 = shalt.err (%p693_p12)  }
  0xd3   :  { %555 = vsyncmov [#allocation3 + $0x7] }
  0xd6   :  { %s556_s14 = vpop.sfrf %555 }
  0xd7   :  { %p694_p13 = scmp.ne.s32.totalorder %s556_s14, 0 }
  0xd9   :  { %560 = shalt.err (%p694_p13)  }

</bundles_post_ra>
